<compile_context>
chip_gen: v5e
topology: v5e:2x2
jax: 0.10.0
libtpu: 0.0.40
codegen_flags: <defaults>
</compile_context>

<pallas_src>
import functools

import jax
import jax.numpy as jnp
from jax import lax
from jax.experimental import pallas as pl
from jax.experimental.pallas import tpu as pltpu


def _attn_kernel(x_ref, adj_ref, w_ref, a_ref, b_ref, o_ref, *, alpha):
    _, N, _ = x_ref.shape
    f32, bf16 = jnp.float32, jnp.bfloat16

    # h = x @ W  (bf16 MXU operands, f32 accumulation)
    xb = x_ref[0].astype(bf16)                                        # (N, F_in)
    h = jnp.dot(xb, w_ref[...].astype(bf16),
                preferred_element_type=f32)                           # (N, D) f32

    # [Wh1 | Wh2] = h @ [a1 | a2]  -- one small MXU matmul
    wh = jnp.dot(h.astype(bf16), a_ref[...].astype(bf16),
                 preferred_element_type=f32)                          # (N, 2)

    # e[i, j] = leaky_relu(Wh1[i] + Wh2[j]); Wh2 moves sublane->lane once here.
    e = wh[:, 0:1] + wh[:, 1:2].reshape(1, N)                         # (N, N)
    e = jnp.where(e >= 0, e, alpha * e)

    # adjacency mask + softmax over the node axis (torch dim=1 -> axis 0 here)
    att = jnp.where(adj_ref[0] > 0, e, f32(-9e15))
    m = jnp.max(att, axis=0, keepdims=True)
    p = jnp.exp(att - m)
    att = p / jnp.sum(p, axis=0, keepdims=True)

    # TODO(synk): F.dropout is identity in eval mode; training-mode dropout
    # would use pltpu.prng_seed + pltpu.stateful_bernoulli here.

    # out = attention @ h, leaky_relu, L2-normalize over node axis, + bias
    out = jnp.dot(att.astype(bf16), h.astype(bf16),
                  preferred_element_type=f32)                         # (N, D)
    out = jnp.where(out >= 0, out, alpha * out)
    ssq = jnp.sum(out * out, axis=0, keepdims=True)                   # (1, D)
    out = out * lax.rsqrt(jnp.maximum(ssq, f32(1e-24)))               # EUP rsqrt
    o_ref[0] = out + b_ref[...]                                       # (1, D) bcast


def attention_layer(x, adj, weight, a, bias, *, alpha=0.2):
    """Pallas implementation of AttentionLayer.forward (eval mode)."""
    B, N, F_in = x.shape
    D = weight.shape[1]

    # Static-in-eval parameter prep (fold into parameter loading in a real
    # pipeline): pack a -> (D, 2) so the kernel gets [Wh1|Wh2] from one matmul.
    a2col = jnp.concatenate([a[:D, :], a[D:, :]], axis=1)             # (D, 2)
    b2 = bias.reshape(1, D).astype(jnp.float32)                       # (1, D)
    # adj arrives as (B, N, N, 1) (torch does adj.squeeze(-1)); the reshape is
    # a layout no-op and the >0 mask test happens in-kernel, so there is no
    # separate XLA cast pass / extra HBM round trip for the mask.
    adj3 = adj.reshape(B, N, N)

    kernel = functools.partial(_attn_kernel, alpha=alpha)

    return pl.pallas_call(
        kernel,
        out_shape=jax.ShapeDtypeStruct((B, N, D), jnp.float32),
        grid=(B,),
        in_specs=[
            pl.BlockSpec((1, N, F_in), lambda b: (b, 0, 0)),   # x
            pl.BlockSpec((1, N, N), lambda b: (b, 0, 0)),      # adjacency (f32)
            pl.BlockSpec((F_in, D), lambda b: (0, 0)),         # weight
            pl.BlockSpec((D, 2), lambda b: (0, 0)),            # [a1 | a2]
            pl.BlockSpec((1, D), lambda b: (0, 0)),            # bias
        ],
        out_specs=pl.BlockSpec((1, N, D), lambda b: (b, 0, 0)),
        compiler_params=pltpu.CompilerParams(
            dimension_semantics=("parallel",)),                # v7x: 2 TCs
    )(x, adj3, weight, a2col, b2)


def _xavier_uniform(key, shape, gain):
    fan_in, fan_out = shape[0], shape[1]
    bound = gain * (6.0 / (fan_in + fan_out)) ** 0.5
    return jax.random.uniform(key, shape, jnp.float32, -bound, bound)


def _reference_forward(x, adj, weight, a, bias, alpha, mm_dtype=jnp.bfloat16):
    """Pure-JAX mirror of the PyTorch module (eval mode).

    Matmul operands are cast to mm_dtype with f32 accumulation so the reference
    uses the same MXU precision as the kernel (pass jnp.float32 for an exact
    reference; the kernel then differs only at bf16 matmul noise level ~1e-2).
    """
    D = weight.shape[1]
    mm = lambda p, q: jnp.matmul(p.astype(mm_dtype), q.astype(mm_dtype),
                                 preferred_element_type=jnp.float32)
    h = mm(x, weight)
    wh1 = mm(h, a[:D, :])
    wh2 = mm(h, a[D:, :])
    e = jax.nn.leaky_relu(wh1 + jnp.transpose(wh2, (0, 2, 1)), alpha)
    att = jnp.where(adj[..., 0] > 0, e, jnp.float32(-9e15))
    att = jax.nn.softmax(att, axis=1)
    out = mm(att, h)
    out = jax.nn.leaky_relu(out, alpha)
    nrm = jnp.maximum(jnp.linalg.norm(out, axis=1, keepdims=True), 1e-12)
    return out / nrm + bias


if __name__ == "__main__":
    B, N = 2, 8
    input_dim, output_dim = 32, 16
    alpha = 0.2

    key = jax.random.PRNGKey(0)
    k_x, k_adj, k_w, k_wi, k_a = jax.random.split(key, 5)

    # Parameters (same shapes / init as the PyTorch module).
    weight = _xavier_uniform(k_w, (input_dim, output_dim), 1.414)
    weight_interact = _xavier_uniform(k_wi, (input_dim, output_dim), 1.414)  # unused in forward
    a = _xavier_uniform(k_a, (2 * output_dim, 1), 1.414)
    bias = jnp.zeros((output_dim,), jnp.float32)    # reset_parameters: bias.fill_(0)

    # Inputs.
    x = jax.random.normal(k_x, (B, N, input_dim), jnp.float32)
    adj = (jax.random.uniform(k_adj, (B, N, N, 1)) > 0.5).astype(jnp.float32)

    out = attention_layer(x, adj, weight, a, bias, alpha=alpha)
    out = jax.block_until_ready(out)

    ref = _reference_forward(x, adj, weight, a, bias, alpha)
    assert out.shape == (B, N, output_dim)
    # Tolerance covers MXU accumulation-order differences and the EUP rsqrt;
    # both kernel and reference use bf16 matmul operands with f32 accumulation.
    assert jnp.allclose(out, ref, atol=3e-3, rtol=3e-3), (
        "mismatch vs reference: max|diff|=%e"
        % float(jnp.max(jnp.abs(out - ref))))

    print("KERNEL_OK")
</pallas_src>

<mosaic_0001>
module attributes {stable_mosaic.version = 11 : i64} {
  func.func @_attn_kernel(%arg0: i32, %arg1: memref<1x8x32xf32, #tpu.memory_space<vmem>>, %arg2: memref<1x8x8xf32, #tpu.memory_space<vmem>>, %arg3: memref<32x16xf32, #tpu.memory_space<vmem>>, %arg4: memref<16x2xf32, #tpu.memory_space<vmem>>, %arg5: memref<1x16xf32, #tpu.memory_space<vmem>>, %arg6: memref<1x8x16xf32, #tpu.memory_space<vmem>>) attributes {dimension_semantics = [#tpu.dimension_semantics<parallel>], iteration_bounds = array<i64: 2>, scalar_prefetch = 0 : i64, scratch_operands = 0 : i64, tpu.core_type = #tpu.core_type<tc>, window_params = [{transform_indices = @transform_0, window_bounds = array<i64: 1, 8, 32>}, {transform_indices = @transform_1, window_bounds = array<i64: 1, 8, 8>}, {pipeline_mode = #tpu.pipeline_mode<synchronous>, transform_indices = @transform_2, window_bounds = array<i64: 32, 16>}, {pipeline_mode = #tpu.pipeline_mode<synchronous>, transform_indices = @transform_3, window_bounds = array<i64: 16, 2>}, {pipeline_mode = #tpu.pipeline_mode<synchronous>, transform_indices = @transform_4, window_bounds = array<i64: 1, 16>}, {transform_indices = @transform_5, window_bounds = array<i64: 1, 8, 16>}]} {
    %c0 = arith.constant 0 : index
    %c0_0 = arith.constant 0 : index
    %c0_1 = arith.constant 0 : index
    %0 = vector.load %arg1[%c0, %c0_0, %c0_1] : memref<1x8x32xf32, #tpu.memory_space<vmem>>, vector<1x8x32xf32>
    %1 = vector.shape_cast %0 : vector<1x8x32xf32> to vector<8x32xf32>
    %2 = arith.truncf %1 : vector<8x32xf32> to vector<8x32xbf16>
    %c0_2 = arith.constant 0 : index
    %c0_3 = arith.constant 0 : index
    %3 = vector.load %arg3[%c0_2, %c0_3] : memref<32x16xf32, #tpu.memory_space<vmem>>, vector<32x16xf32>
    %4 = arith.truncf %3 : vector<32x16xf32> to vector<32x16xbf16>
    %cst = arith.constant dense<0.000000e+00> : vector<8x16xf32>
    %5 = tpu.matmul %2, %4, %cst {dimension_numbers = #tpu.dot_dimension_numbers<[1], [0], [0], [1], [0, 0, 1, 1], [], []>} : vector<8x32xbf16>, vector<32x16xbf16>, vector<8x16xf32> -> vector<8x16xf32>
    %6 = arith.truncf %5 : vector<8x16xf32> to vector<8x16xbf16>
    %c0_4 = arith.constant 0 : index
    %c0_5 = arith.constant 0 : index
    %7 = vector.load %arg4[%c0_4, %c0_5] : memref<16x2xf32, #tpu.memory_space<vmem>>, vector<16x2xf32>
    %8 = arith.truncf %7 : vector<16x2xf32> to vector<16x2xbf16>
    %cst_6 = arith.constant dense<0.000000e+00> : vector<8x2xf32>
    %9 = tpu.matmul %6, %8, %cst_6 {dimension_numbers = #tpu.dot_dimension_numbers<[1], [0], [0], [1], [0, 0, 1, 1], [], []>} : vector<8x16xbf16>, vector<16x2xbf16>, vector<8x2xf32> -> vector<8x2xf32>
    %10 = vector.extract_strided_slice %9 {offsets = [0, 0], sizes = [8, 1], strides = [1, 1]} : vector<8x2xf32> to vector<8x1xf32>
    %11 = vector.extract_strided_slice %9 {offsets = [0, 1], sizes = [8, 1], strides = [1, 1]} : vector<8x2xf32> to vector<8x1xf32>
    %12 = vector.shape_cast %11 : vector<8x1xf32> to vector<1x8xf32>
    %13 = vector.broadcast %10 : vector<8x1xf32> to vector<8x8xf32>
    %14 = vector.broadcast %12 : vector<1x8xf32> to vector<8x8xf32>
    %15 = arith.addf %13, %14 : vector<8x8xf32>
    %cst_7 = arith.constant 0.000000e+00 : f32
    %16 = vector.broadcast %cst_7 : f32 to vector<8x8xf32>
    %17 = arith.cmpf oge, %15, %16 : vector<8x8xf32>
    %cst_8 = arith.constant 2.000000e-01 : f32
    %18 = vector.broadcast %cst_8 : f32 to vector<8x8xf32>
    %19 = arith.mulf %18, %15 : vector<8x8xf32>
    %20 = arith.select %17, %15, %19 : vector<8x8xi1>, vector<8x8xf32>
    %c0_9 = arith.constant 0 : index
    %c0_10 = arith.constant 0 : index
    %c0_11 = arith.constant 0 : index
    %21 = vector.load %arg2[%c0_9, %c0_10, %c0_11] : memref<1x8x8xf32, #tpu.memory_space<vmem>>, vector<1x8x8xf32>
    %22 = vector.shape_cast %21 : vector<1x8x8xf32> to vector<8x8xf32>
    %cst_12 = arith.constant 0.000000e+00 : f32
    %23 = vector.broadcast %cst_12 : f32 to vector<8x8xf32>
    %24 = arith.cmpf ogt, %22, %23 : vector<8x8xf32>
    %cst_13 = arith.constant -9.000000e+15 : f32
    %25 = vector.broadcast %cst_13 : f32 to vector<8x8xf32>
    %26 = arith.select %24, %20, %25 : vector<8x8xi1>, vector<8x8xf32>
    %cst_14 = arith.constant dense<0xFF800000> : vector<8xf32>
    %27 = vector.multi_reduction <maximumf>, %26, %cst_14 [0] : vector<8x8xf32> to vector<8xf32>
    %28 = vector.shape_cast %27 : vector<8xf32> to vector<1x8xf32>
    %29 = vector.broadcast %28 : vector<1x8xf32> to vector<8x8xf32>
    %30 = arith.subf %26, %29 : vector<8x8xf32>
    %31 = math.exp %30 : vector<8x8xf32>
    %cst_15 = arith.constant dense<0.000000e+00> : vector<8xf32>
    %32 = vector.multi_reduction <add>, %31, %cst_15 [0] : vector<8x8xf32> to vector<8xf32>
    %33 = vector.shape_cast %32 : vector<8xf32> to vector<1x8xf32>
    %34 = vector.broadcast %33 : vector<1x8xf32> to vector<8x8xf32>
    %35 = arith.divf %31, %34 : vector<8x8xf32>
    %36 = arith.truncf %35 : vector<8x8xf32> to vector<8x8xbf16>
    %37 = arith.truncf %5 : vector<8x16xf32> to vector<8x16xbf16>
    %cst_16 = arith.constant dense<0.000000e+00> : vector<8x16xf32>
    %38 = tpu.matmul %36, %37, %cst_16 {dimension_numbers = #tpu.dot_dimension_numbers<[1], [0], [0], [1], [0, 0, 1, 1], [], []>} : vector<8x8xbf16>, vector<8x16xbf16>, vector<8x16xf32> -> vector<8x16xf32>
    %cst_17 = arith.constant 0.000000e+00 : f32
    %39 = vector.broadcast %cst_17 : f32 to vector<8x16xf32>
    %40 = arith.cmpf oge, %38, %39 : vector<8x16xf32>
    %cst_18 = arith.constant 2.000000e-01 : f32
    %41 = vector.broadcast %cst_18 : f32 to vector<8x16xf32>
    %42 = arith.mulf %41, %38 : vector<8x16xf32>
    %43 = arith.select %40, %38, %42 : vector<8x16xi1>, vector<8x16xf32>
    %44 = arith.mulf %43, %43 : vector<8x16xf32>
    %cst_19 = arith.constant dense<0.000000e+00> : vector<16xf32>
    %45 = vector.multi_reduction <add>, %44, %cst_19 [0] : vector<8x16xf32> to vector<16xf32>
    %46 = vector.shape_cast %45 : vector<16xf32> to vector<1x16xf32>
    %cst_20 = arith.constant 1.000000e-24 : f32
    %47 = vector.broadcast %cst_20 : f32 to vector<1x16xf32>
    %48 = arith.maximumf %46, %47 : vector<1x16xf32>
    %49 = math.rsqrt %48 : vector<1x16xf32>
    %50 = vector.broadcast %49 : vector<1x16xf32> to vector<8x16xf32>
    %51 = arith.mulf %43, %50 : vector<8x16xf32>
    %c0_21 = arith.constant 0 : index
    %c0_22 = arith.constant 0 : index
    %52 = vector.load %arg5[%c0_21, %c0_22] : memref<1x16xf32, #tpu.memory_space<vmem>>, vector<1x16xf32>
    %53 = vector.broadcast %52 : vector<1x16xf32> to vector<8x16xf32>
    %54 = arith.addf %51, %53 : vector<8x16xf32>
    %c0_23 = arith.constant 0 : index
    %c0_24 = arith.constant 0 : index
    %c0_25 = arith.constant 0 : index
    %55 = vector.load %arg6[%c0_23, %c0_24, %c0_25] : memref<1x8x16xf32, #tpu.memory_space<vmem>>, vector<1x8x16xf32>
    %56 = vector.shape_cast %55 : vector<1x8x16xf32> to vector<8x16xf32>
    %57 = vector.shape_cast %54 : vector<8x16xf32> to vector<1x8x16xf32>
    tpu.vector_store %arg6[%c0_23, %c0_24, %c0_25], %57 {strides = array<i32>} : memref<1x8x16xf32, #tpu.memory_space<vmem>>, vector<1x8x16xf32>,
    return
  }
  func.func @transform_0(%arg0: i32) -> (i32, i32, i32) {
    %c0_i32 = arith.constant 0 : i32
    %c0_i32_0 = arith.constant 0 : i32
    %c0_i32_1 = arith.constant 0 : i32
    return %arg0, %c0_i32, %c0_i32_0 : i32, i32, i32
  }
  func.func @transform_1(%arg0: i32) -> (i32, i32, i32) {
    %c0_i32 = arith.constant 0 : i32
    %c0_i32_0 = arith.constant 0 : i32
    %c0_i32_1 = arith.constant 0 : i32
    return %arg0, %c0_i32, %c0_i32_0 : i32, i32, i32
  }
  func.func @transform_2(%arg0: i32) -> (i32, i32) {
    %c0_i32 = arith.constant 0 : i32
    %c0_i32_0 = arith.constant 0 : i32
    %c0_i32_1 = arith.constant 0 : i32
    return %c0_i32, %c0_i32_0 : i32, i32
  }
  func.func @transform_3(%arg0: i32) -> (i32, i32) {
    %c0_i32 = arith.constant 0 : i32
    %c0_i32_0 = arith.constant 0 : i32
    %c0_i32_1 = arith.constant 0 : i32
    return %c0_i32, %c0_i32_0 : i32, i32
  }
  func.func @transform_4(%arg0: i32) -> (i32, i32) {
    %c0_i32 = arith.constant 0 : i32
    %c0_i32_0 = arith.constant 0 : i32
    %c0_i32_1 = arith.constant 0 : i32
    return %c0_i32, %c0_i32_0 : i32, i32
  }
  func.func @transform_5(%arg0: i32) -> (i32, i32, i32) {
    %c0_i32 = arith.constant 0 : i32
    %c0_i32_0 = arith.constant 0 : i32
    %c0_i32_1 = arith.constant 0 : i32
    return %arg0, %c0_i32, %c0_i32_0 : i32, i32, i32
  }
}

</mosaic_0001>

<bundles_post_ra>
// kernel: tpu_custom_call.1
= control target key start
LH: loop header
LB: loop body
LE: loop exit
PB: predicated region body
PF: predicated region fallthrough
CT: control target
= control target key end

     0   :  { %10 = vsyncpa [#allocation3], 0  ;;  %s767_s0 = inlined_call_operand.vmem [shape: f32[2,8,32], index: 0, kind: input, shape index: {}]   ;;  %s768_s1 = inlined_call_operand.vmem [shape: f32[2,8,8], index: 1, kind: input, shape index: {}]   ;;  %s769_s2 = inlined_call_operand.vmem [shape: f32[32,16], index: 2, kind: input, shape index: {}]   ;;  %s770_s3 = inlined_call_operand.vmem [shape: f32[16,2], index: 3, kind: input, shape index: {}]   ;;  %s771_s4 = inlined_call_operand.vmem [shape: f32[1,16], index: 4, kind: input, shape index: {}]   ;;  %s772_s5 = inlined_call_operand.hbm [shape: f32[2,8,16], index: 5, kind: output, shape index: {}]  }
   0x1   :  { %12 = vsyncpa [#allocation3 + $0x1], 0  ;;  %s645_s18 = smov 0   ;;  %s647_s19 = smov 0  }
   0x2   :  { %s649_s20 = smov 0   ;;  %s651_s21 = smov 0  }
   0x3 LB: > { %s666_s22 = sadd.s32 4294967295, %s611_s21   ;;  %s484_s23 = sadd.s32 4294967294, %s611_s21   ;;  %s611_s21 = sphi %s651_s21, %s778_s21   ;;  %s607_s20 = sphi %s649_s20, %s777_s20   ;;  %s603_s19 = sphi %s647_s19, %s776_s19   ;;  %s599_s18 = sphi %s645_s18, %s775_s18  }
   0x4   : > { %s670_s24 = sadd.s32 1, %s611_s21   ;;  %s140_s25 = sadd.s32 1, %s607_s20 }
   0x5   : > { %s137_s26 = ssub.s32 %s611_s21, %s670_s24  ;;  %p150_p0 = scmp.ne.s32.totalorder %s607_s20, %s603_s19 }
   0x6   : > { %p138_p1 = scmp.eq.s32.totalorder %s137_s26, 0  ;;  %p151_p2 = scmp.eq.s32.totalorder %s666_s22, 1 }
   0x7   : > { %p156_p3 = scmp.ne.s32.totalorder %s603_s19, %s599_s18  ;;  %p157_p4 = scmp.eq.s32.totalorder %s484_s23, 1 }
   0x8   : > { %s681_s27 = scalar_select %p138_p1, %s607_s20, %s140_s25  }
   0x9   : > { %p683_p5 = por %p151_p2, %p150_p0  ;;  %p687_p6 = por %p157_p4, %p156_p3 }
   0xa   : > { %p487_p7 = scmp.ge.s32.totalorder %s611_s21, 1  ;;  %p198_p8 = scmp.lt.s32.totalorder %s611_s21, 3 }
   0xc   : > { %p199_p9 = pnand %p487_p7, %p198_p8 }
   0xd   : > { %p229_p10 = scmp.lt.s32.totalorder (!%p199_p9), %s666_s22, 1  ;;  %s226_s9 = sand.u32 (!%p199_p9), 1, %s603_s19  }
   0xe   : > { %202 = sbr.rel (%p199_p9) target bundleno = 648 (0x288), region = 40  ;;  %s488_s10 = sshll.u32 (!%p199_p9), %s226_s9, 3 }
   0xf   : > { %s495_s11 = sshll.u32 (!%p199_p9), %s666_s22, 3 }
  0x13   : > { %v242_v0 = vld [vmem:[%s769_s2 + $0x10] sm:$0xff]  ;;  %v243_v1 = vld [vmem:[%s769_s2 + $0x18] sm:$0xff]  ;;  %v240_v2 = vld [vmem:[%s769_s2] sm:$0xff]  ;;  %s707_s13 = scalar_select %p229_p10, %s666_s22, 1  ;;  %vm246_vm0 = vcmask 261120   ;;  %v613_v11 = vmov 1   ;;  %v292_v19 = vlaneseq }
  0x14   : > { %v245_v3 = vpack.c.bf16 %v243_v1, %v242_v0  ;;  %v241_v4 = vld [vmem:[%s769_s2 + $0x8] sm:$0xff]  ;;  %v264_v8 = vld [vmem:[%s770_s3] sm:$0xff]  ;;  %539 = vset.pattern.permute.xlu0 %v613_v11  ;;  %vm267_vm1 = vcmask 130048   ;;  %vm352_vm2 = vcmask 1043456   ;;  %v614_v18 = vmov 0   ;;  %s398_s22 = scalar_lea.sflag [#allocation3], %s226_s9 }
  0x15   : > { %v244_v5 = vpack.c.bf16 %v241_v4, %v240_v2  ;;  %s489_s14 = sshll.u32 %s707_s13, 3  ;;  %v265_v9 = vld [vmem:[%s770_s3 + $0x8] sm:$0xff]  ;;  %v293_v21 = vand.u32 127, %v292_v19  ;;  %vm315_vm5 = vcmask 64512  }
  0x16   : > { %256 = vmatpush.bf16.msra.mxu0 %v245_v3  ;;  %s232_s17 = scalar_lea.vmem %s767_s0, %s489_s14  ;;  %v266_v10 = vpack.c.bf16 %v265_v9, %v264_v8  ;;  %s236_s8 = scalar_lea.vmem %s768_s1, %s489_s14 }
  0x17   : > { %v238_v6 = vld [vmem:[%s232_s17] sm:$0xff]  ;;  %s408_s14 = scalar_lea.hbm %s772_s5, %s495_s11  ;;  %s228_s17 = scalar_lea.vmem [#allocation2], %s488_s10 }
  0x18   : > { %v239_v7 = vpack.c.bf16 %v238_v6, %v238_v6  ;;  %278 = vmatpush.bf16.msra.mxu1 %v266_v10  ;;  %v312_v24 = vld [vmem:[%s236_s8] sm:$0xff]  ;;  %s410_s23 = sshll.u32 %s228_s17, 4  ;;  %s412_s25 = sshll.u32 %s408_s14, 4  ;;  %s411_s23 = int_to_ptr.vmem [resolvable:$true] %s410_s23  ;;  %s413_s25 = int_to_ptr.hbm [resolvable:$true] %s412_s25 }
  0x19   : > { %vm313_vm4 = vcmp.gt.f32.partialorder %v312_v24, 0.0  ;;  %s563_s26 = sshra.s32 %s413_s25, 4  ;;  %s569_s8 = scalar_lea.hbm %s772_s5, 16  ;;  %s564_s26 = int_to_ptr.hbm [resolvable:$true] %s563_s26 }
  0x1a   : > { %257 = vmatpush.bf16.msra.mxu0 %v244_v5  ;;  %s565_s30 = scalar_lea.hbm %s564_s26, 8  ;;  %p570_p0 = scmp.lt.s32.totalorder %s564_s26, %s772_s5 }
  0x1b   : > { %p566_p11 = scmp.ne.s32.totalorder %s564_s26, %s565_s30  ;;  %p571_p1 = scmp.lt.s32.totalorder %s569_s8, %s565_s30 }
  0x1d   : > { %491 = vmatmul.msk.bf16.vlgmr.msra.gmra.mxu0 %vm246_vm0, %v239_v7  ;;  %p567_p12 = pnand %p566_p11, %p683_p5  ;;  %p572_p2 = por %p571_p1, %p570_p0 }
  0x1f   : > { %p568_p13 = pneg %p567_p12 }
  0x21   : > { %p573_p3 = pnand %p572_p2, %p568_p13 }
  0x9a   : > { %v259_v12 = vpop.f32.mrf.mxu0 }
  0x9b   : > { %v263_v13 = vpack.c.bf16 %v259_v12, %v259_v12 }
  0x9d   : > { %492 = vmatmul.msk.bf16.vlgmr.msra.gmra.mxu1 %vm267_vm1, %v263_v13  ;;  %v353_v14 = vsel %vm352_vm2, %v263_v13, 0  ;;  %v542_v13 = vld [vmem:[%s771_s4] ss:$0 sm:$0xff] }
  0x9e   : > { %362 = vmatpush.bf16.msra.mxu2 %v353_v14 }
  0xa2   : > { %v261_v15 = vpop.f32.mrf.mxu0 }
 0x11a   : > { %v280_v16 = vpop.f32.mrf.mxu1 }
 0x11b   : > { %290 = vperm.xlu0 %539, %v280_v16  }
 0x122   : > { %v282_v17 = vpop.f32.mrf.mxu1 }
 0x123   : > { %540 = vset.pattern.permute.xlu0 %v614_v18 }
 0x124   : > { %286 = vperm.xlu0 %540, %v280_v16  }
 0x12c   : > { %541 = vset.pattern.permute.xlu0 %v613_v11 }
 0x18d   : > { %v291_v20 = vpop.permute.xlu0 %290 }
 0x18e   : > { %v294_v22 = vperm.slane %v291_v20, %v293_v21 }
 0x196   : > { %v287_v23 = vpop.permute.xlu0 %286 }
 0x197   : > { %v308_v25 = vadd.f32 %v294_v22, %v287_v23 }
 0x199   : > { %vm309_vm3 = vcmp.ge.f32.partialorder %v308_v25, 0.0  ;;  %v310_v26 = vmul.f32 0.2, %v308_v25 }
 0x19b   : > { %v311_v27 = vsel %vm309_vm3, %v308_v25, %v310_v26 }
 0x19c   : > { %v314_v28 = vsel %vm313_vm4, %v311_v27, -9e+15 }
 0x19d   : > { %v316_v29 = vsel %vm315_vm5, %v314_v28, -inf }
 0x19e   : > { %v317_v30 = vrot.slane %v316_v29, 4 }
 0x1a0   : > { %v318_v31 = vmax.f32 %v316_v29, %v317_v30 }
 0x1a2   : > { %v319_v32 = vrot.slane %v318_v31, 2 }
 0x1a4   : > { %v320_v33 = vmax.f32 %v318_v31, %v319_v32 }
 0x1a6   : > { %v321_v34 = vrot.slane %v320_v33, 1 }
 0x1a8   : > { %v322_v35 = vmax.f32 %v320_v33, %v321_v34 }
 0x1aa   : > { %v323_v36 = vsub.f32 %v314_v28, %v322_v35 }
 0x1ac   : > { %v324_v37 = vmul.f32 1.442695, %v323_v36 }
 0x1ae   : > { %543 = vpow2.f32 %v324_v37 }
 0x1b4   : > { %v544_v38 = vpop.eup %543 }
 0x1b5   : > { %v326_v39 = vsel %vm315_vm5, %v544_v38, 0.0 }
 0x1b6   : > { %v327_v40 = vrot.slane %v326_v39, 4 }
 0x1b8   : > { %v328_v41 = vadd.f32 %v327_v40, %v326_v39 }
 0x1ba   : > { %v329_v42 = vrot.slane %v328_v41, 2 }
 0x1bc   : > { %v330_v43 = vadd.f32 %v329_v42, %v328_v41 }
 0x1be   : > { %v331_v44 = vrot.slane %v330_v43, 1 }
 0x1c0   : > { %v332_v45 = vadd.f32 %v331_v44, %v330_v43 }
 0x1c2   : > { %545 = vrcp.f32 %v332_v45  ;;  %v344_v49 = vand.u32 2147483648, %v332_v45  ;;  %v342_v51 = vand.u32 2147483647, %v332_v45  ;;  %vm338_vm7 = vweird.f32 %v332_v45 }
 0x1c4   : > { %v345_v53 = vor.u32 1.1754944e-38, %v344_v49  ;;  %vm343_vm9 = vcmp.eq.f32.partialorder %v342_v51, 8.507059e+37 }
 0x1c8   : > { %v546_v46 = vpop.eup %545 }
 0x1c9   : > { %v334_v47 = vmul.f32 %v546_v46, %v332_v45  ;;  %vm339_vm6 = vweird.f32 %v546_v46 }
 0x1ca   : > { %vm340_vm8 = vmor %vm338_vm7, %vm339_vm6 }
 0x1cb   : > { %v335_v48 = vsub.f32 1.0, %v334_v47 }
 0x1cd   : > { %v336_v50 = vmul.f32 %v546_v46, %v335_v48 }
 0x1cf   : > { %v337_v52 = vadd.f32 %v546_v46, %v336_v50 }
 0x1d1   : > { %v341_v54 = vsel %vm340_vm8, %v546_v46, %v337_v52 }
 0x1d2   : > { %v346_v55 = vsel %vm343_vm9, %v345_v53, %v341_v54 }
 0x1d3   : > { %v347_v56 = vmul.f32 %v544_v38, %v346_v55 }
 0x1d5   : > { %v348_v57 = vpack.c.bf16 %v347_v56, %v347_v56 }
 0x1d7   : > { %493 = vmatmul.msk.bf16.vlgmr.msra.gmra.mxu2 %vm315_vm5, %v348_v57 }
 0x25a   : > { %v364_v58 = vpop.f32.mrf.mxu2 }
 0x25b   : > { %vm368_vm10 = vcmp.ge.f32.partialorder %v364_v58, 0.0  ;;  %v369_v59 = vmul.f32 0.2, %v364_v58 }
 0x25d   : > { %v370_v60 = vsel %vm368_vm10, %v364_v58, %v369_v59 }
 0x25e   : > { %v371_v61 = vmul.f32 %v370_v60, %v370_v60 }
 0x260   : > { %v372_v62 = vsel %vm267_vm1, %v371_v61, 0.0 }
 0x261   : > { %v373_v63 = vrot.slane %v372_v62, 4 }
 0x262   : > { %v366_v0 = vpop.f32.mrf.mxu2 }
 0x263   : > { %v374_v1 = vadd.f32 %v373_v63, %v372_v62 }
 0x265   : > { %v375_v2 = vrot.slane %v374_v1, 2 }
 0x267   : > { %v376_v3 = vadd.f32 %v375_v2, %v374_v1 }
 0x269   : > { %v377_v4 = vrot.slane %v376_v3, 1 }
 0x26b   : > { %v378_v5 = vadd.f32 %v377_v4, %v376_v3 }
 0x26d   : > { %v379_v6 = vmax.f32 %v378_v5, 1e-24 }
 0x26f   : > { %547 = vrsqrt.f32 %v379_v6  ;;  %vm386_vm12 = vweird.f32 %v379_v6 }
 0x275   : > { %v548_v7 = vpop.eup %547 }
 0x276   : > { %v381_v8 = vmul.f32 %v548_v7, %v379_v6  ;;  %vm387_vm11 = vweird.f32 %v548_v7 }
 0x277   : > { %vm388_vm13 = vmor %vm386_vm12, %vm387_vm11 }
 0x278   : > { %v382_v9 = vmul.f32 %v548_v7, %v381_v8 }
 0x27a   : > { %v383_v10 = vmul.f32 0.5, %v382_v9 }
 0x27c   : > { %v384_v11 = vsub.f32 1.5, %v383_v10 }
 0x27e   : > { %v385_v12 = vmul.f32 %v548_v7, %v384_v11 }
 0x280   : > { %v389_v14 = vsel %vm388_vm13, %v548_v7, %v385_v12 }
 0x281   : > { %v390_v15 = vmul.f32 %v389_v14, %v370_v60 }
 0x283   : > { %v395_v16 = vadd.f32 %v542_v13, %v390_v15 }
 0x285   : > { %396 = vst.msk [vmem:[%s228_s17] sm:$0xff] %vm267_vm1, %v395_v16 }
 0x286   : > { %576 = shalt.err (!%p573_p3)
}
 0x287   : > { %498 = dma.vmem_to_hbm [thread:$0]  (%p683_p5), %s411_s23, 128, %s413_s25, %s398_s22  }
 0x288 PF: > { %p504_p4 = scmp.ge.s32.totalorder %s611_s21, 2  ;;  %s424_s9 = sand.u32 1, %s599_s18  }
 0x289   : > { %s425_s12 = scalar_lea.sflag [#allocation3], %s424_s9 }
 0x28a   : > { %p501_p7 = pnand %p504_p4, %p687_p6 }
 0x28c   : > { %p502_p8 = pneg %p501_p7 }
 0x28e   : > { %594 = dma.done.wait (%p502_p8), %s425_s12, 128  }
 0x28f   : > { %596 = vsyncadd (%p502_p8), %s425_s12, 4294967168  ;;  %p15_p9 = scmp.ge.s32.totalorder %s670_s24, 4   ;;  %s775_s18 = smov %s603_s19 }
 0x290   : > { %s776_s19 = smov %s607_s20  ;;  %s777_s20 = smov %s681_s27 }
 0x291   : > { %s778_s21 = smov %s670_s24  ;;  %17 = sbr.rel (!%p15_p9) target bundleno = 3 (0x3), region = 78 }
 0x296   :  { %431 = vsyncpa [#allocation3], 1 }
 0x297   :  { %433 = vsyncpa [#allocation3 + $0x1], 1 }

</bundles_post_ra>
